<compile_context>
chip_gen: v5e
topology: v5e:2x2
jax: 0.10.0
libtpu: 0.0.40
codegen_flags: <defaults>
</compile_context>

<pallas_src>
import jax
import jax.numpy as jnp
from jax.experimental import pallas as pl
from jax.experimental.pallas import tpu as pltpu

HIDDEN = 128   # hidden width of the Actor MLP (fixed by the PyTorch module)
LANE = 128     # TPU vreg lane width
SUBLANE = 8    # TPU vreg sublane count (f32)


def _round_up(x: int, m: int) -> int:
    return (x + m - 1) // m * m


def actor_kernel(x_ref, w1_ref, b1_ref, w2_ref, b2_ref, w3_ref, b3_ref, o_ref):
    # Layer 1: relu(x @ W1 + b1)   (bf16 MXU inputs, f32 accumulation)
    h = jnp.dot(x_ref[...], w1_ref[...], preferred_element_type=jnp.float32)
    h = jnp.maximum(h + b1_ref[...], 0.0)
    # Layer 2: relu(h @ W2 + b2)
    h = jnp.dot(h.astype(w2_ref.dtype), w2_ref[...],
                preferred_element_type=jnp.float32)
    h = jnp.maximum(h + b2_ref[...], 0.0)
    # Output layer: tanh(h @ W3 + b3)   (lane-dense padded output columns)
    a = jnp.dot(h.astype(w3_ref.dtype), w3_ref[...],
                preferred_element_type=jnp.float32)
    o_ref[...] = jnp.tanh(a + b3_ref[...]).astype(o_ref.dtype)


def actor_forward(state, params, *, tile_b: int = 256,
                  compute_dtype=jnp.bfloat16):
    """state: (B, in_dim) f32.
    params: dict of (fan_in, fan_out) weights + (1, fan_out) biases."""
    B, in_dim = state.shape
    out_dim = params["w3"].shape[1]

    in_pad = _round_up(in_dim, LANE)     # lane-dense contraction dim
    out_pad = _round_up(out_dim, LANE)   # lane-dense output store
    # Batch tile: sublane-aligned; collapse to a single tile for small batches.
    tile_b = min(tile_b, _round_up(B, SUBLANE))
    tile_b = _round_up(tile_b, SUBLANE)
    b_pad = _round_up(B, tile_b)
    num_tiles = b_pad // tile_b

    # Zero-pad + cast in the wrapper. Padded K rows/cols contribute exactly 0
    # to the dots; padded batch rows / out columns are sliced off afterwards.
    x = jnp.zeros((b_pad, in_pad), compute_dtype).at[:B, :in_dim].set(
        state.astype(compute_dtype))
    w1 = jnp.zeros((in_pad, HIDDEN), compute_dtype).at[:in_dim, :].set(
        params["w1"].astype(compute_dtype))
    w2 = params["w2"].astype(compute_dtype)
    w3 = jnp.zeros((HIDDEN, out_pad), compute_dtype).at[:, :out_dim].set(
        params["w3"].astype(compute_dtype))
    b1 = params["b1"].astype(jnp.float32)
    b2 = params["b2"].astype(jnp.float32)
    b3 = jnp.zeros((1, out_pad), jnp.float32).at[:, :out_dim].set(
        params["b3"].astype(jnp.float32))

    # Weights / biases: constant index_map -> VMEM resident across the grid.
    resident = lambda shp: pl.BlockSpec(shp, lambda i: (0, 0))

    flops = 2 * b_pad * (in_pad * HIDDEN + HIDDEN * HIDDEN + HIDDEN * out_pad)
    bytes_accessed = (
        x.size * x.dtype.itemsize
        + sum(a.size * a.dtype.itemsize for a in (w1, b1, w2, b2, w3, b3))
        + b_pad * out_pad * 4)

    out = pl.pallas_call(
        actor_kernel,
        out_shape=jax.ShapeDtypeStruct((b_pad, out_pad), jnp.float32),
        grid=(num_tiles,),
        in_specs=[
            pl.BlockSpec((tile_b, in_pad), lambda i: (i, 0)),   # state tile
            resident(w1.shape), resident(b1.shape),
            resident(w2.shape), resident(b2.shape),
            resident(w3.shape), resident(b3.shape),
        ],
        out_specs=pl.BlockSpec((tile_b, out_pad), lambda i: (i, 0)),
        compiler_params=pltpu.CompilerParams(
            dimension_semantics=("parallel",),      # shard batch over TCs (v7x)
            vmem_limit_bytes=32 * 1024 * 1024,      # safe on v5e/v6e/v7x
        ),
        cost_estimate=pl.CostEstimate(
            flops=flops,
            transcendentals=b_pad * out_pad,        # tanh
            bytes_accessed=bytes_accessed),
    )(x, w1, b1, w2, b2, w3, b3)

    return out[:B, :out_dim]


def init_actor_params(key, in_dim: int, out_dim: int, init_w: float = 3e-3):
    """PyTorch-style init (Linear default + custom out-layer init).
    Weights stored pre-transposed as (fan_in, fan_out)."""
    k1, k2, k3, k4, k5, k6 = jax.random.split(key, 6)

    def uniform(k, shape, bound):
        return jax.random.uniform(k, shape, jnp.float32, -bound, bound)

    bound1 = 1.0 / jnp.sqrt(in_dim)
    bound2 = 1.0 / jnp.sqrt(128.0)
    return {
        "w1": uniform(k1, (in_dim, HIDDEN), bound1),
        "b1": uniform(k2, (1, HIDDEN), bound1),
        "w2": uniform(k3, (HIDDEN, HIDDEN), bound2),
        "b2": uniform(k4, (1, HIDDEN), bound2),
        "w3": uniform(k5, (HIDDEN, out_dim), init_w),
        "b3": uniform(k6, (1, out_dim), init_w),
    }


def actor_ref(state, params, compute_dtype=jnp.float32):
    """Pure-JAX reference (optionally with the same bf16 matmul inputs)."""
    h = jnp.dot(state.astype(compute_dtype), params["w1"].astype(compute_dtype),
                preferred_element_type=jnp.float32)
    h = jnp.maximum(h + params["b1"], 0.0)
    h = jnp.dot(h.astype(compute_dtype), params["w2"].astype(compute_dtype),
                preferred_element_type=jnp.float32)
    h = jnp.maximum(h + params["b2"], 0.0)
    a = jnp.dot(h.astype(compute_dtype), params["w3"].astype(compute_dtype),
                preferred_element_type=jnp.float32)
    return jnp.tanh(a + params["b3"])


if __name__ == "__main__":
    key = jax.random.PRNGKey(0)
    k_params, k_state = jax.random.split(key)

    batch, in_dim, out_dim = 2, 8, 4
    params = init_actor_params(k_params, in_dim, out_dim)
    state = jax.random.normal(k_state, (batch, in_dim), jnp.float32)

    action = actor_forward(state, params)
    jax.block_until_ready(action)
    assert action.shape == (batch, out_dim)

    # Tight check against a reference using the same bf16 matmul inputs.
    ref_bf16 = actor_ref(state, params, compute_dtype=jnp.bfloat16)
    assert jnp.allclose(action, ref_bf16, atol=1e-3, rtol=1e-3)

    # Loose check against the full-f32 PyTorch-equivalent forward.
    ref_f32 = actor_ref(state, params, compute_dtype=jnp.float32)
    assert jnp.allclose(action, ref_f32, atol=2e-2, rtol=2e-2)

    print("KERNEL_OK")
</pallas_src>

<mosaic_0001>
module attributes {stable_mosaic.version = 11 : i64} {
  func.func @actor_kernel(%arg0: i32, %arg1: memref<8x128xbf16, #tpu.memory_space<vmem>>, %arg2: memref<128x128xbf16, #tpu.memory_space<vmem>>, %arg3: memref<1x128xf32, #tpu.memory_space<vmem>>, %arg4: memref<128x128xbf16, #tpu.memory_space<vmem>>, %arg5: memref<1x128xf32, #tpu.memory_space<vmem>>, %arg6: memref<128x128xbf16, #tpu.memory_space<vmem>>, %arg7: memref<1x128xf32, #tpu.memory_space<vmem>>, %arg8: memref<8x128xf32, #tpu.memory_space<vmem>>) attributes {dimension_semantics = [#tpu.dimension_semantics<parallel>], iteration_bounds = array<i64: 1>, scalar_prefetch = 0 : i64, scratch_operands = 0 : i64, tpu.core_type = #tpu.core_type<tc>, window_params = [{transform_indices = @transform_0, window_bounds = array<i64: 8, 128>}, {pipeline_mode = #tpu.pipeline_mode<synchronous>, transform_indices = @transform_1, window_bounds = array<i64: 128, 128>}, {pipeline_mode = #tpu.pipeline_mode<synchronous>, transform_indices = @transform_2, window_bounds = array<i64: 1, 128>}, {pipeline_mode = #tpu.pipeline_mode<synchronous>, transform_indices = @transform_3, window_bounds = array<i64: 128, 128>}, {pipeline_mode = #tpu.pipeline_mode<synchronous>, transform_indices = @transform_4, window_bounds = array<i64: 1, 128>}, {pipeline_mode = #tpu.pipeline_mode<synchronous>, transform_indices = @transform_5, window_bounds = array<i64: 128, 128>}, {pipeline_mode = #tpu.pipeline_mode<synchronous>, transform_indices = @transform_6, window_bounds = array<i64: 1, 128>}, {transform_indices = @transform_7, window_bounds = array<i64: 8, 128>}]} {
    %c0 = arith.constant 0 : index
    %c0_0 = arith.constant 0 : index
    %0 = vector.load %arg1[%c0, %c0_0] : memref<8x128xbf16, #tpu.memory_space<vmem>>, vector<8x128xbf16>
    %c0_1 = arith.constant 0 : index
    %c0_2 = arith.constant 0 : index
    %1 = vector.load %arg2[%c0_1, %c0_2] : memref<128x128xbf16, #tpu.memory_space<vmem>>, vector<128x128xbf16>
    %cst = arith.constant dense<0.000000e+00> : vector<8x128xf32>
    %2 = tpu.matmul %0, %1, %cst {dimension_numbers = #tpu.dot_dimension_numbers<[1], [0], [0], [1], [0, 0, 1, 1], [], []>} : vector<8x128xbf16>, vector<128x128xbf16>, vector<8x128xf32> -> vector<8x128xf32>
    %c0_3 = arith.constant 0 : index
    %c0_4 = arith.constant 0 : index
    %3 = vector.load %arg3[%c0_3, %c0_4] : memref<1x128xf32, #tpu.memory_space<vmem>>, vector<1x128xf32>
    %4 = vector.broadcast %3 : vector<1x128xf32> to vector<8x128xf32>
    %5 = arith.addf %2, %4 : vector<8x128xf32>
    %cst_5 = arith.constant 0.000000e+00 : f32
    %6 = vector.broadcast %cst_5 : f32 to vector<8x128xf32>
    %7 = arith.maximumf %5, %6 : vector<8x128xf32>
    %8 = arith.truncf %7 : vector<8x128xf32> to vector<8x128xbf16>
    %c0_6 = arith.constant 0 : index
    %c0_7 = arith.constant 0 : index
    %9 = vector.load %arg4[%c0_6, %c0_7] : memref<128x128xbf16, #tpu.memory_space<vmem>>, vector<128x128xbf16>
    %cst_8 = arith.constant dense<0.000000e+00> : vector<8x128xf32>
    %10 = tpu.matmul %8, %9, %cst_8 {dimension_numbers = #tpu.dot_dimension_numbers<[1], [0], [0], [1], [0, 0, 1, 1], [], []>} : vector<8x128xbf16>, vector<128x128xbf16>, vector<8x128xf32> -> vector<8x128xf32>
    %c0_9 = arith.constant 0 : index
    %c0_10 = arith.constant 0 : index
    %11 = vector.load %arg5[%c0_9, %c0_10] : memref<1x128xf32, #tpu.memory_space<vmem>>, vector<1x128xf32>
    %12 = vector.broadcast %11 : vector<1x128xf32> to vector<8x128xf32>
    %13 = arith.addf %10, %12 : vector<8x128xf32>
    %cst_11 = arith.constant 0.000000e+00 : f32
    %14 = vector.broadcast %cst_11 : f32 to vector<8x128xf32>
    %15 = arith.maximumf %13, %14 : vector<8x128xf32>
    %16 = arith.truncf %15 : vector<8x128xf32> to vector<8x128xbf16>
    %c0_12 = arith.constant 0 : index
    %c0_13 = arith.constant 0 : index
    %17 = vector.load %arg6[%c0_12, %c0_13] : memref<128x128xbf16, #tpu.memory_space<vmem>>, vector<128x128xbf16>
    %cst_14 = arith.constant dense<0.000000e+00> : vector<8x128xf32>
    %18 = tpu.matmul %16, %17, %cst_14 {dimension_numbers = #tpu.dot_dimension_numbers<[1], [0], [0], [1], [0, 0, 1, 1], [], []>} : vector<8x128xbf16>, vector<128x128xbf16>, vector<8x128xf32> -> vector<8x128xf32>
    %c0_15 = arith.constant 0 : index
    %c0_16 = arith.constant 0 : index
    %19 = vector.load %arg7[%c0_15, %c0_16] : memref<1x128xf32, #tpu.memory_space<vmem>>, vector<1x128xf32>
    %20 = vector.broadcast %19 : vector<1x128xf32> to vector<8x128xf32>
    %21 = arith.addf %18, %20 : vector<8x128xf32>
    %22 = math.tanh %21 : vector<8x128xf32>
    %c0_17 = arith.constant 0 : index
    %c0_18 = arith.constant 0 : index
    %23 = vector.load %arg8[%c0_17, %c0_18] : memref<8x128xf32, #tpu.memory_space<vmem>>, vector<8x128xf32>
    tpu.vector_store %arg8[%c0_17, %c0_18], %22 {strides = array<i32>} : memref<8x128xf32, #tpu.memory_space<vmem>>, vector<8x128xf32>,
    return
  }
  func.func @transform_0(%arg0: i32) -> (i32, i32) {
    %c0_i32 = arith.constant 0 : i32
    %c0_i32_0 = arith.constant 0 : i32
    return %arg0, %c0_i32 : i32, i32
  }
  func.func @transform_1(%arg0: i32) -> (i32, i32) {
    %c0_i32 = arith.constant 0 : i32
    %c0_i32_0 = arith.constant 0 : i32
    %c0_i32_1 = arith.constant 0 : i32
    return %c0_i32, %c0_i32_0 : i32, i32
  }
  func.func @transform_2(%arg0: i32) -> (i32, i32) {
    %c0_i32 = arith.constant 0 : i32
    %c0_i32_0 = arith.constant 0 : i32
    %c0_i32_1 = arith.constant 0 : i32
    return %c0_i32, %c0_i32_0 : i32, i32
  }
  func.func @transform_3(%arg0: i32) -> (i32, i32) {
    %c0_i32 = arith.constant 0 : i32
    %c0_i32_0 = arith.constant 0 : i32
    %c0_i32_1 = arith.constant 0 : i32
    return %c0_i32, %c0_i32_0 : i32, i32
  }
  func.func @transform_4(%arg0: i32) -> (i32, i32) {
    %c0_i32 = arith.constant 0 : i32
    %c0_i32_0 = arith.constant 0 : i32
    %c0_i32_1 = arith.constant 0 : i32
    return %c0_i32, %c0_i32_0 : i32, i32
  }
  func.func @transform_5(%arg0: i32) -> (i32, i32) {
    %c0_i32 = arith.constant 0 : i32
    %c0_i32_0 = arith.constant 0 : i32
    %c0_i32_1 = arith.constant 0 : i32
    return %c0_i32, %c0_i32_0 : i32, i32
  }
  func.func @transform_6(%arg0: i32) -> (i32, i32) {
    %c0_i32 = arith.constant 0 : i32
    %c0_i32_0 = arith.constant 0 : i32
    %c0_i32_1 = arith.constant 0 : i32
    return %c0_i32, %c0_i32_0 : i32, i32
  }
  func.func @transform_7(%arg0: i32) -> (i32, i32) {
    %c0_i32 = arith.constant 0 : i32
    %c0_i32_0 = arith.constant 0 : i32
    return %arg0, %c0_i32 : i32, i32
  }
}

</mosaic_0001>

<bundles_post_ra>
// kernel: tpu_custom_call.1
= control target key start
LH: loop header
LB: loop body
LE: loop exit
PB: predicated region body
PF: predicated region fallthrough
CT: control target
= control target key end

     0   :  { %12 = vsyncpa [#allocation3], 0  ;;  %s688_s0 = inlined_call_operand.hbm [shape: bf16[8,128], index: 0, kind: input, shape index: {}]   ;;  %s689_s1 = inlined_call_operand.hbm [shape: bf16[128,128], index: 1, kind: input, shape index: {}]   ;;  %s690_s2 = inlined_call_operand.vmem [shape: f32[1,128], index: 2, kind: input, shape index: {}]   ;;  %s691_s3 = inlined_call_operand.hbm [shape: bf16[128,128], index: 3, kind: input, shape index: {}]   ;;  %s692_s4 = inlined_call_operand.vmem [shape: f32[1,128], index: 4, kind: input, shape index: {}]   ;;  %s693_s5 = inlined_call_operand.hbm [shape: bf16[128,128], index: 5, kind: input, shape index: {}]   ;;  %s694_s6 = inlined_call_operand.vmem [shape: f32[1,128], index: 6, kind: input, shape index: {}]   ;;  %s695_s7 = inlined_call_operand.hbm [shape: f32[8,128], index: 7, kind: output, shape index: {}]  }
   0x1   :  { %13 = vsyncpa [#allocation6], 0 }
   0x2   :  { %14 = vsyncpa [#allocation9], 0  ;;  %s31_s26 = sshll.u32 %s689_s1, 4  ;;  %s32_s26 = int_to_ptr.hbm [resolvable:$true] %s31_s26 }
   0x3   :  { %15 = vsyncpa [#allocation4], 0  ;;  %s617_s27 = smov [#allocation5]   ;;  %s21_s8 = sshll.u32 %s688_s0, 4  ;;  %s22_s8 = int_to_ptr.hbm [resolvable:$true] %s21_s8 }
   0x4   :  { %s33_s28 = sshll.u32 %s617_s27, 4  ;;  %s618_s9 = smov 64   ;;  %s34_s28 = int_to_ptr.vmem [resolvable:$true] %s33_s28 }
   0x5   :  { %s619_s10 = smov 4   ;;  %s620_s11 = smov [#allocation2]  }
   0x6   :  { %39 = dma.hbm_to_vmem [thread:$0]  %s32_s26, 1024, %s34_s28, [#allocation6], %s618_s9, %s618_s9, %s619_s10  }
   0x7   :  { %s23_s12 = sshll.u32 %s620_s11, 4  ;;  %s46_s15 = sshll.u32 %s691_s3, 4  ;;  %s24_s12 = int_to_ptr.vmem [resolvable:$true] %s23_s12  ;;  %s47_s15 = int_to_ptr.hbm [resolvable:$true] %s46_s15 }
   0x8   :  { %26 = dma.hbm_to_vmem [thread:$0]  %s22_s8, 64, %s24_s12, [#allocation3]  }
   0x9   :  { %s61_s17 = sshll.u32 %s693_s5, 4  ;;  %s621_s18 = smov [#allocation7]   ;;  %s62_s17 = int_to_ptr.hbm [resolvable:$true] %s61_s17 }
   0xa   :  { %s48_s19 = sshll.u32 %s621_s18, 4  ;;  %s622_s0 = smov [#allocation8]   ;;  %s49_s19 = int_to_ptr.vmem [resolvable:$true] %s48_s19 }
   0xb   :  { %54 = dma.hbm_to_vmem [thread:$0]  %s47_s15, 1024, %s49_s19, [#allocation6], %s618_s9, %s618_s9, %s619_s10  }
   0xc   :  { %s63_s20 = sshll.u32 %s622_s0, 4  ;;  %s64_s20 = int_to_ptr.vmem [resolvable:$true] %s63_s20 }
   0xd   :  { %69 = dma.hbm_to_vmem [thread:$0]  %s62_s17, 1024, %s64_s20, [#allocation9], %s618_s9, %s618_s9, %s619_s10  }
   0xe   :  { %609 = dma.done.wait [#allocation3], 64  }
   0xf   :  { %610 = vsyncadd [#allocation3], 4294967232 }
  0x10   :  { %611 = dma.done.wait [#allocation6], 2048  }
  0x11   :  { %612 = vsyncadd [#allocation6], 4294965248 }
  0x12   :  { %613 = dma.done.wait [#allocation9], 1024  }
  0x13   :  { %614 = vsyncadd [#allocation9], 4294966272  ;;  %v460_v0 = vld [vmem:[#allocation5 + $0x38] sm:$0xff]  ;;  %v459_v1 = vld [vmem:[#allocation5 + $0x30] sm:$0xff]  ;;  %s623_s24 = smov [#allocation10]   ;;  %s345_s28 = sshll.u32 %s695_s7, 4  ;;  %s346_s28 = int_to_ptr.hbm [resolvable:$true] %s345_s28 }
  0x14   :  { %157 = vmatpush.bf16.msra.mxu0 %v460_v0  ;;  %v468_v2 = vld [vmem:[#allocation7 + $0x38] sm:$0xff]  ;;  %v467_v3 = vld [vmem:[#allocation7 + $0x30] sm:$0xff]  ;;  %v458_v4 = vld [vmem:[#allocation5 + $0x28] sm:$0xff]  ;;  %s343_s25 = sshll.u32 %s623_s24, 4  ;;  %s344_s25 = int_to_ptr.vmem [resolvable:$true] %s343_s25 }
  0x15   :  { %240 = vmatpush.bf16.msra.mxu1 %v468_v2  ;;  %v466_v5 = vld [vmem:[#allocation7 + $0x28] sm:$0xff]  ;;  %v457_v6 = vld [vmem:[#allocation5 + $0x20] sm:$0xff]  ;;  %v456_v8 = vld [vmem:[#allocation5 + $0x18] sm:$0xff] }
  0x16   :  { %v465_v7 = vld [vmem:[#allocation7 + $0x20] sm:$0xff]  ;;  %v464_v9 = vld [vmem:[#allocation7 + $0x18] sm:$0xff]  ;;  %v455_v10 = vld [vmem:[#allocation5 + $0x10] sm:$0xff] }
  0x17   :  { %v463_v11 = vld [vmem:[#allocation7 + $0x10] sm:$0xff]  ;;  %v454_v12 = vld [vmem:[#allocation5 + $0x8] sm:$0xff]  ;;  %v453_v13 = vld [vmem:[#allocation5] sm:$0xff] }
  0x18   :  { %158 = vmatpush.bf16.msra.mxu0 %v459_v1  ;;  %v88_v14 = vld [vmem:[#allocation2] sm:$0xf]  ;;  %v462_v15 = vld [vmem:[#allocation7 + $0x8] sm:$0xff]  ;;  %v461_v16 = vld [vmem:[#allocation7] sm:$0xff] }
  0x19   :  { %241 = vmatpush.bf16.msra.mxu1 %v467_v3  ;;  %v476_v17 = vld [vmem:[#allocation8 + $0x38] sm:$0xff]  ;;  %v475_v18 = vld [vmem:[#allocation8 + $0x30] sm:$0xff]  ;;  %v474_v19 = vld [vmem:[#allocation8 + $0x28] sm:$0xff] }
  0x1a   :  { %323 = vmatpush.bf16.msra.mxu2 %v476_v17  ;;  %v473_v20 = vld [vmem:[#allocation8 + $0x20] sm:$0xff]  ;;  %v472_v21 = vld [vmem:[#allocation8 + $0x18] sm:$0xff]  ;;  %v471_v22 = vld [vmem:[#allocation8 + $0x10] sm:$0xff] }
  0x1b   :  { %v484_v23 = vld [vmem:[%s690_s2] ss:$0 sm:$0xff]  ;;  %v470_v29 = vld [vmem:[#allocation8 + $0x8] sm:$0xff]  ;;  %v469_v30 = vld [vmem:[#allocation8] sm:$0xff] }
  0x1c   :  { %159 = vmatpush.bf16.msra.mxu0 %v458_v4  ;;  %v485_v31 = vld [vmem:[%s692_s4] ss:$0 sm:$0xff] }
  0x1d   :  { %242 = vmatpush.bf16.msra.mxu1 %v466_v5  ;;  %v486_v37 = vld [vmem:[%s694_s6] ss:$0 sm:$0xff] }
  0x1e   :  { %324 = vmatpush.bf16.msra.mxu2 %v475_v18 }
  0x20   :  { %160 = vmatpush.bf16.msra.mxu0 %v457_v6 }
  0x21   :  { %243 = vmatpush.bf16.msra.mxu1 %v465_v7 }
  0x22   :  { %325 = vmatpush.bf16.msra.mxu2 %v474_v19 }
  0x24   :  { %161 = vmatpush.bf16.msra.mxu0 %v456_v8 }
  0x25   :  { %244 = vmatpush.bf16.msra.mxu1 %v464_v9 }
  0x26   :  { %326 = vmatpush.bf16.msra.mxu2 %v473_v20 }
  0x28   :  { %162 = vmatpush.bf16.msra.mxu0 %v455_v10 }
  0x29   :  { %245 = vmatpush.bf16.msra.mxu1 %v463_v11 }
  0x2a   :  { %327 = vmatpush.bf16.msra.mxu2 %v472_v21 }
  0x2c   :  { %163 = vmatpush.bf16.msra.mxu0 %v454_v12 }
  0x2d   :  { %246 = vmatpush.bf16.msra.mxu1 %v462_v15 }
  0x2e   :  { %328 = vmatpush.bf16.msra.mxu2 %v471_v22 }
  0x30   :  { %164 = vmatpush.bf16.msra.mxu0 %v453_v13 }
  0x31   :  { %247 = vmatpush.bf16.msra.mxu1 %v461_v16 }
  0x32   :  { %329 = vmatpush.bf16.msra.mxu2 %v470_v29 }
  0x33   :  { %165 = vmatmul.bf16.vlgmr.msra.gmra.mxu0 %v88_v14 }
  0x36   :  { %330 = vmatpush.bf16.msra.mxu2 %v469_v30 }
  0xb0   :  { %v166_v24 = vpop.f32.mrf.mxu0 }
  0xb1   :  { %v167_v25 = vadd.f32 %v484_v23, %v166_v24 }
  0xb3   :  { %v170_v26 = vmax.f32 %v167_v25, 0.0 }
  0xb5   :  { %v171_v27 = vpack.c.bf16 %v170_v26, %v170_v26 }
  0xb7   :  { %248 = vmatmul.bf16.vlgmr.msra.gmra.mxu1 %v171_v27 }
  0xb8   :  { %v168_v28 = vpop.f32.mrf.mxu0 }
 0x134   :  { %v249_v32 = vpop.f32.mrf.mxu1 }
 0x135   :  { %v250_v33 = vadd.f32 %v485_v31, %v249_v32 }
 0x137   :  { %v253_v34 = vmax.f32 %v250_v33, 0.0 }
 0x139   :  { %v254_v35 = vpack.c.bf16 %v253_v34, %v253_v34 }
 0x13b   :  { %331 = vmatmul.bf16.vlgmr.msra.gmra.mxu2 %v254_v35 }
 0x13c   :  { %v251_v36 = vpop.f32.mrf.mxu1 }
 0x1be   :  { %v332_v38 = vpop.f32.mrf.mxu2 }
 0x1bf   :  { %v333_v39 = vadd.f32 %v486_v37, %v332_v38 }
 0x1c1   :  { %487 = vtanh.f32 %v333_v39 }
 0x1c6   :  { %v334_v40 = vpop.f32.mrf.mxu2 }
 0x1c7   :  { %v488_v41 = vpop.eup %487 }
 0x1c8   :  { %337 = vst [vmem:[#allocation10] sm:$0xff] %v488_v41 }
 0x1c9   :  { %348 = dma.vmem_to_hbm [thread:$0]  %s344_s25, 128, %s346_s28, [#allocation4]  }
 0x1ca   :  { %615 = dma.done.wait [#allocation4], 128  }
 0x1cb   :  { %616 = vsyncadd [#allocation4], 4294967168 }
 0x1cc   :  { %353 = vsyncpa [#allocation3], 1 }
 0x1cd   :  { %354 = vsyncpa [#allocation6], 1 }
 0x1ce   :  { %355 = vsyncpa [#allocation9], 1 }
 0x1cf   :  { %356 = vsyncpa [#allocation4], 1 }

</bundles_post_ra>
